<compile_context>
chip_gen: v7x
topology: tpu7x:2x2x1
jax: 0.10.0
libtpu: 0.0.40
codegen_flags: <defaults>
</compile_context>

<pallas_src>
import functools

import jax
import jax.numpy as jnp
from jax.experimental import pallas as pl
from jax.experimental.pallas import tpu as pltpu

IN_FEATURES = 10
OUT_FEATURES = 1

# Rows folded onto the lane axis per "group row".  64 is the smallest group such
# that GROUP * IN_FEATURES (= 640) is a multiple of the 128-lane vreg width, so
# the x tile has zero lane padding in VMEM.
GROUP = 64
GROUP_LANES = GROUP * IN_FEATURES  # 640 = 5 * 128


def _round_up(n: int, m: int) -> int:
    return ((n + m - 1) // m) * m


def linear_kernel(b_ref, s_ref, x_ref, o_ref):
    # b_ref: (1,)                     f32, SMEM scalar bias
    # s_ref: (GROUP_LANES, GROUP)     f32, VMEM block-diagonal weight fold
    # x_ref: (tbr, GROUP_LANES)       VMEM, lane-dense x tile (64 rows / lane-row)
    # o_ref: (tbr, GROUP)             output tile (64 outputs / lane-row)
    acc = jnp.dot(x_ref[...], s_ref[...], preferred_element_type=jnp.float32)
    o_ref[...] = (acc + b_ref[0]).astype(o_ref.dtype)


def simple_model_forward(x, weight, bias, *, max_block_rows=1024):
    """Pallas forward for SimpleModel: y = x @ W^T + b with W (1, 10), b (1,)."""
    B, K = x.shape
    assert K == IN_FEATURES
    out_dtype = x.dtype

    # Pad the batch to a multiple of GROUP only if needed (<= 63 extra rows).
    b_pad = _round_up(B, GROUP)
    if b_pad != B:
        x = jnp.pad(x, ((0, b_pad - B), (0, 0)))

    # Layout-compatible (bitcast) reshape: row-major (b_pad, 10) -> (b_pad/64, 640).
    n_groups = b_pad // GROUP
    x_view = x.reshape(n_groups, GROUP_LANES)

    # Fold W into a block-diagonal (640, 64) matrix so one MXU dot applies the
    # weights and reduces each group of 10 lanes to its row's output:
    #   S[10*j + k, j] = W[0, k]
    w_row = weight.reshape(IN_FEATURES).astype(jnp.float32)
    s_mat = (
        jnp.eye(GROUP, dtype=jnp.float32)[:, None, :] * w_row[None, :, None]
    ).reshape(GROUP_LANES, GROUP)
    b_vec = bias.reshape(OUT_FEATURES).astype(jnp.float32)

    # Block-row tile: 1024 group rows = 65536 batch rows = 2.5 MiB per x buffer.
    if n_groups <= max_block_rows:
        tbr = n_groups                       # single block == full extent
    else:
        tbr = max(8, (max_block_rows // 8) * 8)  # sublane-aligned tile
    grid = (pl.cdiv(n_groups, tbr),)         # ragged last block handled by Pallas

    y_groups = pl.pallas_call(
        linear_kernel,
        out_shape=jax.ShapeDtypeStruct((n_groups, GROUP), out_dtype),
        grid_spec=pltpu.PrefetchScalarGridSpec(
            num_scalar_prefetch=0,
            grid=grid,
            in_specs=[
                # Bias scalar rides the scalar path in SMEM.
                pl.BlockSpec(memory_space=pltpu.MemorySpace.SMEM),
                # Folded weight: full array, constant block index -> stays
                # resident in VMEM across grid steps (no re-DMA).
                pl.BlockSpec((GROUP_LANES, GROUP), lambda i: (0, 0)),
                # x tile: contiguous HBM rows, fully lane-dense in VMEM.
                pl.BlockSpec((tbr, GROUP_LANES), lambda i: (i, 0)),
            ],
            out_specs=pl.BlockSpec((tbr, GROUP), lambda i: (i, 0)),
        ),
        compiler_params=pltpu.CompilerParams(
            # TODO(synk): pltpu.CORE_PARALLEL / pl.core_map for guaranteed 2-TC
            # sharding on v7x; "parallel" kept for portability across generations.
            dimension_semantics=("parallel",),
            vmem_limit_bytes=32 * 1024 * 1024,
        ),
        cost_estimate=pl.CostEstimate(
            flops=2 * b_pad * IN_FEATURES * OUT_FEATURES,
            transcendentals=0,
            bytes_accessed=(b_pad * IN_FEATURES + b_pad * OUT_FEATURES) * 4
            + (GROUP_LANES * GROUP + OUT_FEATURES) * 4,
        ),
    )(b_vec, s_mat, x_view)

    # Bitcast reshape back to (b_pad, 1); drop pad rows if any.
    y = y_groups.reshape(b_pad, OUT_FEATURES)
    if b_pad != B:
        y = y[:B]
    return y


if __name__ == "__main__":
    key = jax.random.PRNGKey(0)
    kw, kb, kx1, kx2, kx3 = jax.random.split(key, 5)

    # Deterministic nn.Linear-style init: uniform(-1/sqrt(in), 1/sqrt(in)).
    bound = 1.0 / float(IN_FEATURES) ** 0.5
    weight = jax.random.uniform(
        kw, (OUT_FEATURES, IN_FEATURES), jnp.float32, minval=-bound, maxval=bound
    )
    bias = jax.random.uniform(
        kb, (OUT_FEATURES,), jnp.float32, minval=-bound, maxval=bound
    )

    def check(x, out):
        ref = x @ weight.T + bias
        assert out.shape == (x.shape[0], OUT_FEATURES)
        # Tolerance covers possible bf16-pass decomposition of the f32 MXU
        # matmul (worst case ~1e-2); kernel logic/indexing errors would be O(1).
        assert jnp.allclose(out, ref, atol=2e-2, rtol=2e-2), float(
            jnp.max(jnp.abs(out - ref))
        )

    fwd = jax.jit(simple_model_forward)

    # 1) Batch aligned to the 64-row group: copy-free wrapper, single grid step.
    x1 = jax.random.normal(kx1, (128, IN_FEATURES), jnp.float32)
    out1 = fwd(x1, weight, bias)
    jax.block_until_ready(out1)
    check(x1, out1)

    # 2) Unaligned batch: exercises the small tail pad + output slice.
    x2 = jax.random.normal(kx2, (200, IN_FEATURES), jnp.float32)
    out2 = fwd(x2, weight, bias)
    jax.block_until_ready(out2)
    check(x2, out2)

    # 3) Multi-step grid with a ragged last block (small tile override).
    x3 = jax.random.normal(kx3, (640, IN_FEATURES), jnp.float32)
    out3 = jax.jit(functools.partial(simple_model_forward, max_block_rows=8))(
        x3, weight, bias
    )
    jax.block_until_ready(out3)
    check(x3, out3)

    print("KERNEL_OK")
</pallas_src>

<mosaic_0001>
module attributes {stable_mosaic.version = 11 : i64} {
  func.func @linear_kernel(%arg0: i32, %arg1: memref<1xf32, #tpu.memory_space<smem>>, %arg2: memref<640x64xf32, #tpu.memory_space<vmem>>, %arg3: memref<2x640xf32, #tpu.memory_space<vmem>>, %arg4: memref<2x64xf32, #tpu.memory_space<vmem>>) attributes {dimension_semantics = [#tpu.dimension_semantics<parallel>], iteration_bounds = array<i64: 1>, scalar_prefetch = 0 : i64, scratch_operands = 0 : i64, tpu.core_type = #tpu.core_type<tc>, window_params = [{transform_indices = @transform_0, window_bounds = array<i64: 1>}, {pipeline_mode = #tpu.pipeline_mode<synchronous>, transform_indices = @transform_1, window_bounds = array<i64: 640, 64>}, {transform_indices = @transform_2, window_bounds = array<i64: 2, 640>}, {transform_indices = @transform_3, window_bounds = array<i64: 2, 64>}]} {
    %c0 = arith.constant 0 : index
    %c0_0 = arith.constant 0 : index
    %0 = vector.load %arg3[%c0, %c0_0] : memref<2x640xf32, #tpu.memory_space<vmem>>, vector<2x640xf32>
    %c0_1 = arith.constant 0 : index
    %c0_2 = arith.constant 0 : index
    %1 = vector.load %arg2[%c0_1, %c0_2] : memref<640x64xf32, #tpu.memory_space<vmem>>, vector<640x64xf32>
    %cst = arith.constant dense<0.000000e+00> : vector<2x64xf32>
    %2 = tpu.matmul %0, %1, %cst {dimension_numbers = #tpu.dot_dimension_numbers<[1], [0], [0], [1], [0, 0, 1, 1], [], []>} : vector<2x640xf32>, vector<640x64xf32>, vector<2x64xf32> -> vector<2x64xf32>
    %c0_3 = arith.constant 0 : index
    %3 = memref.load %arg1[%c0_3] : memref<1xf32, #tpu.memory_space<smem>>
    %4 = vector.broadcast %3 : f32 to vector<2x64xf32>
    %5 = arith.addf %2, %4 : vector<2x64xf32>
    %c0_4 = arith.constant 0 : index
    %c0_5 = arith.constant 0 : index
    %6 = vector.load %arg4[%c0_4, %c0_5] : memref<2x64xf32, #tpu.memory_space<vmem>>, vector<2x64xf32>
    tpu.vector_store %arg4[%c0_4, %c0_5], %5 {strides = array<i32>} : memref<2x64xf32, #tpu.memory_space<vmem>>, vector<2x64xf32>,
    return
  }
  func.func @transform_0(%arg0: i32) -> i32 {
    %c0_i32 = arith.constant 0 : i32
    %c0_i32_0 = arith.constant 0 : i32
    return %c0_i32 : i32
  }
  func.func @transform_1(%arg0: i32) -> (i32, i32) {
    %c0_i32 = arith.constant 0 : i32
    %c0_i32_0 = arith.constant 0 : i32
    %c0_i32_1 = arith.constant 0 : i32
    return %c0_i32, %c0_i32_0 : i32, i32
  }
  func.func @transform_2(%arg0: i32) -> (i32, i32) {
    %c0_i32 = arith.constant 0 : i32
    %c0_i32_0 = arith.constant 0 : i32
    return %arg0, %c0_i32 : i32, i32
  }
  func.func @transform_3(%arg0: i32) -> (i32, i32) {
    %c0_i32 = arith.constant 0 : i32
    %c0_i32_0 = arith.constant 0 : i32
    return %arg0, %c0_i32 : i32, i32
  }
}

</mosaic_0001>

<bundles_post_ra>
// kernel: simple_model_forward.1
= control target key start
LH: loop header
LB: loop body
LE: loop exit
PB: predicated region body
PF: predicated region fallthrough
CT: control target
= control target key end

     0   :  { %v562_v43 = vmov 1983009808   ;;  %v105_v45 = vlaneseq  ;;  %vm564_vm0 = vmmov 0   ;;  %vm340_vm1 = vcmask 517120   ;;  %s838_s1 = inlined_call_operand.vmem [shape: f32[640,64], index: 1, kind: input, shape index: {}]   ;;  %s839_s2 = inlined_call_operand.vmem [shape: f32[2,640], index: 2, kind: input, shape index: {}]   ;;  %s840_s0 = inlined_call_operand.<no memory space> [shape: f32[1], index: 0, kind: input, shape index: {}]   ;;  %s841_s3 = inlined_call_operand.vmem [shape: f32[2,64], index: 3, kind: output, shape index: {}]  }
   0x1   :  { %v33_v0 = vld [vmem:[%s838_s1 + $0x80] sm:$0xff]  ;;  %v34_v1 = vld [vmem:[%s838_s1 + $0x88] sm:$0xff]  ;;  %v35_v11 = vld [vmem:[%s838_s1 + $0x90] sm:$0xff]  ;;  %v103_v44 = vunpack.c.l.s4 %v562_v43 }
   0x2   :  { %v17_v2 = vld [vmem:[%s838_s1] sm:$0xff]  ;;  %v469_v3 = vpack.c.bf16 %v34_v1, %v33_v0  ;;  %v18_v4 = vld [vmem:[%s838_s1 + $0x8] sm:$0xff]  ;;  %v36_v13 = vld [vmem:[%s838_s1 + $0x98] sm:$0xff]  ;;  %v106_v60 = vshrl.u32 %v105_v45, 7 }
   0x3   :  { %v65_v5 = vld [vmem:[%s838_s1 + $0x180] sm:$0xff]  ;;  %v66_v6 = vld [vmem:[%s838_s1 + $0x188] sm:$0xff]  ;;  %v471_v7 = vpack.c.bf16 %v18_v4, %v17_v2  ;;  %v19_v14 = vld [vmem:[%s838_s1 + $0x10] sm:$0xff]  ;;  %v473_v16 = vpack.c.bf16 %v36_v13, %v35_v11  ;;  %v104_v59 = vunpack.c.0.s8 %v103_v44 }
   0x4   :  { %v501_v8 = vpack.c.bf16 %v66_v6, %v65_v5  ;;  %v49_v9 = vld [vmem:[%s838_s1 + $0x100] sm:$0xff]  ;;  %v50_v10 = vld [vmem:[%s838_s1 + $0x108] sm:$0xff]  ;;  %470 = vmatprep.subr.bf16.mxu0 %v469_v3  ;;  %v20_v15 = vld [vmem:[%s838_s1 + $0x18] sm:$0xff] }
   0x5   :  { %v503_v12 = vpack.c.bf16 %v50_v10, %v49_v9  ;;  %472 = vmatpush3.bf16.msra.mxu0 %v471_v7  ;;  %v475_v17 = vpack.c.bf16 %v20_v15, %v19_v14  ;;  %v67_v18 = vld [vmem:[%s838_s1 + $0x190] sm:$0xff]  ;;  %v68_v19 = vld [vmem:[%s838_s1 + $0x198] sm:$0xff]  ;;  %v37_v23 = vld [vmem:[%s838_s1 + $0xa0] sm:$0xff]  ;;  %v107_v10 = vsub.s32 %v104_v59, %v106_v60 }
   0x6   :  { %502 = vmatprep.subr.bf16.mxu1 %v501_v8  ;;  %v51_v20 = vld [vmem:[%s838_s1 + $0x110] sm:$0xff]  ;;  %v505_v21 = vpack.c.bf16 %v68_v19, %v67_v18  ;;  %v52_v22 = vld [vmem:[%s838_s1 + $0x118] sm:$0xff]  ;;  %v38_v24 = vld [vmem:[%s838_s1 + $0xa8] sm:$0xff]  ;;  %474 = vmatprep.subr.bf16.mxu0 %v473_v16 }
   0x7   :  { %504 = vmatpush3.bf16.msra.mxu1 %v503_v12  ;;  %v507_v25 = vpack.c.bf16 %v52_v22, %v51_v20  ;;  %v477_v26 = vpack.c.bf16 %v38_v24, %v37_v23  ;;  %v21_v27 = vld [vmem:[%s838_s1 + $0x20] sm:$0xff]  ;;  %v22_v28 = vld [vmem:[%s838_s1 + $0x28] sm:$0xff]  ;;  %v39_v35 = vld [vmem:[%s838_s1 + $0xb0] sm:$0xff] }
   0x8   :  { %v69_v29 = vld [vmem:[%s838_s1 + $0x1a0] sm:$0xff]  ;;  %506 = vmatprep.subr.bf16.mxu1 %v505_v21  ;;  %v70_v30 = vld [vmem:[%s838_s1 + $0x1a8] sm:$0xff]  ;;  %v479_v33 = vpack.c.bf16 %v22_v28, %v21_v27  ;;  %v40_v36 = vld [vmem:[%s838_s1 + $0xb8] sm:$0xff] }
   0x9   :  { %v53_v31 = vld [vmem:[%s838_s1 + $0x120] sm:$0xff]  ;;  %v54_v32 = vld [vmem:[%s838_s1 + $0x128] sm:$0xff]  ;;  %476 = vmatpush3.bf16.msra.mxu0 %v475_v17  ;;  %v509_v34 = vpack.c.bf16 %v70_v30, %v69_v29  ;;  %v23_v37 = vld [vmem:[%s838_s1 + $0x30] sm:$0xff]  ;;  %v481_v39 = vpack.c.bf16 %v40_v36, %v39_v35 }
   0xa   :  { %478 = vmatprep.subr.bf16.mxu0 %v477_v26  ;;  %v511_v38 = vpack.c.bf16 %v54_v32, %v53_v31  ;;  %v24_v40 = vld [vmem:[%s838_s1 + $0x38] sm:$0xff]  ;;  %v71_v41 = vld [vmem:[%s838_s1 + $0x1b0] sm:$0xff]  ;;  %v41_v49 = vld [vmem:[%s838_s1 + $0xc0] sm:$0xff] }
   0xb   :  { %508 = vmatpush3.bf16.msra.mxu1 %v507_v25  ;;  %v72_v42 = vld [vmem:[%s838_s1 + $0x1b8] sm:$0xff]  ;;  %v55_v47 = vld [vmem:[%s838_s1 + $0x130] sm:$0xff]  ;;  %v42_v50 = vld [vmem:[%s838_s1 + $0xc8] sm:$0xff]  ;;  %v483_v51 = vpack.c.bf16 %v24_v40, %v23_v37 }
   0xc   :  { %510 = vmatprep.subr.bf16.mxu1 %v509_v34  ;;  %v513_v46 = vpack.c.bf16 %v72_v42, %v71_v41  ;;  %v56_v48 = vld [vmem:[%s838_s1 + $0x138] sm:$0xff]  ;;  %v73_v52 = vld [vmem:[%s838_s1 + $0x1c0] sm:$0xff]  ;;  %v74_v53 = vld [vmem:[%s838_s1 + $0x1c8] sm:$0xff]  ;;  %v485_v55 = vpack.c.bf16 %v42_v50, %v41_v49 }
   0xd   :  { %480 = vmatpush3.bf16.msra.mxu0 %v479_v33  ;;  %v515_v54 = vpack.c.bf16 %v56_v48, %v55_v47  ;;  %v25_v56 = vld [vmem:[%s838_s1 + $0x40] sm:$0xff]  ;;  %v26_v57 = vld [vmem:[%s838_s1 + $0x48] sm:$0xff]  ;;  %v517_v61 = vpack.c.bf16 %v74_v53, %v73_v52  ;;  %v43_v63 = vld [vmem:[%s838_s1 + $0xd0] sm:$0xff]  ;;  %v563_v47 = vmov 0.0|0.0   ;;  %v565_v53 = vmov 0.0  }
   0xe   :  { %482 = vmatprep.subr.bf16.mxu0 %v481_v39  ;;  %v57_v58 = vld [vmem:[%s838_s1 + $0x140] sm:$0xff]  ;;  %v58_v62 = vld [vmem:[%s838_s1 + $0x148] sm:$0xff]  ;;  %v44_v0 = vld [vmem:[%s838_s1 + $0xd8] sm:$0xff]  ;;  %v487_v3 = vpack.c.bf16 %v26_v57, %v25_v56 }
   0xf   :  { %512 = vmatpush3.bf16.msra.mxu1 %v511_v38  ;;  %v75_v1 = vld [vmem:[%s838_s1 + $0x1d0] sm:$0xff]  ;;  %v76_v2 = vld [vmem:[%s838_s1 + $0x1d8] sm:$0xff]  ;;  %v519_v5 = vpack.c.bf16 %v58_v62, %v57_v58  ;;  %v489_v6 = vpack.c.bf16 %v44_v0, %v43_v63  ;;  %v45_v12 = vld [vmem:[%s838_s1 + $0xe0] sm:$0xff] }
  0x10   :  { %514 = vmatprep.subr.bf16.mxu1 %v513_v46  ;;  %v27_v4 = vld [vmem:[%s838_s1 + $0x50] sm:$0xff]  ;;  %v28_v7 = vld [vmem:[%s838_s1 + $0x58] sm:$0xff]  ;;  %v521_v11 = vpack.c.bf16 %v76_v2, %v75_v1  ;;  %v46_v13 = vld [vmem:[%s838_s1 + $0xe8] sm:$0xff] }
  0x11   :  { %484 = vmatpush3.bf16.msra.mxu0 %v483_v51  ;;  %v59_v8 = vld [vmem:[%s838_s1 + $0x150] sm:$0xff]  ;;  %v60_v9 = vld [vmem:[%s838_s1 + $0x158] sm:$0xff]  ;;  %v77_v14 = vld [vmem:[%s838_s1 + $0x1e0] sm:$0xff]  ;;  %v491_v16 = vpack.c.bf16 %v28_v7, %v27_v4  ;;  %v493_v19 = vpack.c.bf16 %v46_v13, %v45_v12 }
  0x12   :  { %486 = vmatprep.subr.bf16.mxu0 %v485_v55  ;;  %v78_v15 = vld [vmem:[%s838_s1 + $0x1e8] sm:$0xff]  ;;  %v523_v17 = vpack.c.bf16 %v60_v9, %v59_v8  ;;  %v15_v18 = vld [vmem:[%s839_s2] sm:$0xff]  ;;  %v47_v27 = vld [vmem:[%s838_s1 + $0xf0] sm:$0xff]  ;;  %v98_v8 = vstv %s840_s0 }
  0x13   :  { %516 = vmatpush3.bf16.msra.mxu1 %v515_v54  ;;  %v29_v20 = vld [vmem:[%s838_s1 + $0x60] sm:$0xff]  ;;  %v30_v21 = vld [vmem:[%s838_s1 + $0x68] sm:$0xff]  ;;  %v108_v23 = vrot.slane %v15_v18, %v107_v10  ;;  %v101_v24 = vcombine.high %v15_v18, %v15_v18  ;;  %v525_v25 = vpack.c.bf16 %v78_v15, %v77_v14  ;;  %v48_v28 = vld [vmem:[%s838_s1 + $0xf8] sm:$0xff] }
  0x14   :  { %518 = vmatprep.subr.bf16.mxu1 %v517_v61  ;;  %v61_v22 = vld [vmem:[%s838_s1 + $0x160] sm:$0xff]  ;;  %v62_v26 = vld [vmem:[%s838_s1 + $0x168] sm:$0xff]  ;;  %v79_v29 = vld [vmem:[%s838_s1 + $0x1f0] sm:$0xff]  ;;  %v495_v33 = vpack.c.bf16 %v30_v21, %v29_v20  ;;  %v497_v35 = vpack.c.bf16 %v48_v28, %v47_v27 }
  0x15   :  { %488 = vmatpush3.bf16.msra.mxu0 %v487_v3  ;;  %v80_v30 = vld [vmem:[%s838_s1 + $0x1f8] sm:$0xff]  ;;  %v116_v31 = vcombine.high %v108_v23, %v108_v23  ;;  %v115_v32 = vrot.slane %v101_v24, %v107_v10  ;;  %v527_v34 = vpack.c.bf16 %v62_v26, %v61_v22  ;;  %v31_v36 = vld [vmem:[%s838_s1 + $0x70] sm:$0xff]  ;;  %v81_v44 = vld [vmem:[%s838_s1 + $0x200] sm:$0xff] }
  0x16   :  { %490 = vmatprep.subr.bf16.mxu0 %v489_v6  ;;  %v32_v37 = vld [vmem:[%s838_s1 + $0x78] sm:$0xff]  ;;  %v529_v39 = vpack.c.bf16 %v80_v30, %v79_v29  ;;  %v63_v40 = vld [vmem:[%s838_s1 + $0x170] sm:$0xff]  ;;  %v82_v45 = vld [vmem:[%s838_s1 + $0x208] sm:$0xff] }
  0x17   :  { %520 = vmatpush3.bf16.msra.mxu1 %v519_v5  ;;  %v117_v38 = vcombine.high %v115_v32, %v115_v32  ;;  %194 = vmatprep.mubr.f32.mxu0 %v116_v31  ;;  %v64_v41 = vld [vmem:[%s838_s1 + $0x178] sm:$0xff]  ;;  %v499_v42 = vpack.c.bf16 %v32_v37, %v31_v36  ;;  %v534_v46 = vpack.c.bf16 %v82_v45, %v81_v44  ;;  %v83_v48 = vld [vmem:[%s838_s1 + $0x210] sm:$0xff]  ;;  %v85_v51 = vld [vmem:[%s838_s1 + $0x220] sm:$0xff] }
  0x18   :  { %522 = vmatprep.subr.bf16.mxu1 %v521_v11  ;;  %v531_v43 = vpack.c.bf16 %v64_v41, %v63_v40  ;;  %v84_v49 = vld [vmem:[%s838_s1 + $0x218] sm:$0xff]  ;;  %v86_v52 = vld [vmem:[%s838_s1 + $0x228] sm:$0xff]  ;;  %v87_v55 = vld [vmem:[%s838_s1 + $0x230] sm:$0xff] }
  0x19   :  { %492 = vmatpush3.bf16.msra.mxu0 %v491_v16  ;;  %264 = vmatprep.mubr.f32.mxu1 %v117_v38  ;;  %v537_v50 = vpack.c.bf16 %v84_v49, %v83_v48  ;;  %v540_v54 = vpack.c.bf16 %v86_v52, %v85_v51  ;;  %v88_v56 = vld [vmem:[%s838_s1 + $0x238] sm:$0xff]  ;;  %v89_v58 = vld [vmem:[%s838_s1 + $0x240] sm:$0xff]  ;;  %v90_v59 = vld [vmem:[%s838_s1 + $0x248] sm:$0xff] }
  0x1a   :  { %494 = vmatprep.subr.bf16.mxu0 %v493_v19  ;;  %v543_v57 = vpack.c.bf16 %v88_v56, %v87_v55  ;;  %v546_v60 = vpack.c.bf16 %v90_v59, %v89_v58  ;;  %v91_v61 = vld [vmem:[%s838_s1 + $0x250] sm:$0xff]  ;;  %v92_v62 = vld [vmem:[%s838_s1 + $0x258] sm:$0xff]  ;;  %v93_v0 = vld [vmem:[%s838_s1 + $0x260] sm:$0xff] }
  0x1b   :  { %524 = vmatpush3.bf16.msra.mxu1 %v523_v17  ;;  %v549_v63 = vpack.c.bf16 %v92_v62, %v91_v61  ;;  %v94_v1 = vld [vmem:[%s838_s1 + $0x268] sm:$0xff]  ;;  %v95_v3 = vld [vmem:[%s838_s1 + $0x270] sm:$0xff]  ;;  %v96_v4 = vld [vmem:[%s838_s1 + $0x278] sm:$0xff] }
  0x1c   :  { %526 = vmatprep.subr.bf16.mxu1 %v525_v25  ;;  %v552_v2 = vpack.c.bf16 %v94_v1, %v93_v0  ;;  %v555_v5 = vpack.c.bf16 %v96_v4, %v95_v3  ;;  %v346_v6 = vld.sshfl [vmem:[%s839_s2 + $0x8] sm:$0x3 pattern:$0x76325410] }
  0x1d   :  { %496 = vmatpush3.bf16.msra.mxu0 %v495_v33 }
  0x1e   :  { %498 = vmatprep.subr.bf16.mxu0 %v497_v35 }
  0x1f   :  { %528 = vmatpush3.bf16.msra.mxu1 %v527_v34 }
  0x20   :  { %530 = vmatprep.subr.bf16.mxu1 %v529_v39 }
  0x21   :  { %500 = vmatpush3.bf16.msra.mxu0 %v499_v42 }
  0x22   :  { %533 = vmatprep.subr.bf16.mxu0 %v563_v47 }
  0x23   :  { %532 = vmatpush3.bf16.msra.mxu1 %v531_v43 }
  0x24   :  { %195 = vmatmul.mubr.f32.vlgmr.msra.gmra.mrb[0].mxu0 %v108_v23 }
  0x25   :  { %535 = vmatpush3.bf16.msra.mxu0 %v534_v46  ;;  %466 = vmatprep.mubr.msk.f32.mxu0 %vm564_vm0, %v565_v53 }
  0x26   :  { %265 = vmatmul.mubr.f32.vlgmr.msra.gmra.mrb[0].mxu1 %v115_v32  ;;  %536 = vmatprep.subr.bf16.mxu0 %v563_v47 }
  0x29   :  { %538 = vmatpush3.bf16.msra.mxu0 %v537_v50 }
  0x2a   :  { %539 = vmatprep.subr.bf16.mxu0 %v563_v47 }
  0x2d   :  { %541 = vmatpush3.bf16.msra.mxu0 %v540_v54 }
  0x2e   :  { %542 = vmatprep.subr.bf16.mxu0 %v563_v47 }
  0x31   :  { %544 = vmatpush3.bf16.msra.mxu0 %v543_v57 }
  0x32   :  { %545 = vmatprep.subr.bf16.mxu0 %v563_v47 }
  0x35   :  { %547 = vmatpush3.bf16.msra.mxu0 %v546_v60 }
  0x36   :  { %548 = vmatprep.subr.bf16.mxu0 %v563_v47 }
  0x39   :  { %550 = vmatpush3.bf16.msra.mxu0 %v549_v63 }
  0x3a   :  { %551 = vmatprep.subr.bf16.mxu0 %v563_v47 }
  0x3d   :  { %553 = vmatpush3.bf16.msra.mxu0 %v552_v2 }
  0x3e   :  { %554 = vmatprep.subr.bf16.mxu0 %v563_v47 }
  0x41   :  { %556 = vmatpush3.bf16.msra.mxu0 %v555_v5 }
  0x44   :  { %467 = vmatmul.mubr.f32.vlgmr.msra.gmra.mrb[2].mxu0 %v346_v6 }
  0xf7   :  { %v379_v7 = vpop.f32.mrb[0].mxu0 }
  0xf8   :  { %v380_v9 = vpop.f32.mrb[1].mxu0 }
  0xf9   :  { %v414_v10 = vpop.f32.mrb[0].mxu1  ;;  %v381_v11 = vadd.f32 %v380_v9, %v379_v7 }
  0xfa   :  { %v415_v12 = vpop.f32.mrb[1].mxu1 }
  0xfb   :  { %v416_v13 = vadd.f32 %v415_v12, %v414_v10  ;;  %v197_v14 = vadd.f32 %v381_v11, %v98_v8 }
  0xfd   :  { %v267_v15 = vadd.f32 %v416_v13, %v197_v14 }
 0x117   :  { %v336_v16 = vpop.f32.mrb[2].mxu0 }
 0x118   :  { %v337_v17 = vadd.f32 %v336_v16, %v267_v15  ;;  %v468_v18 = vpop.f32.mrb[3].mxu0 }
 0x11a   :  { %341 = vst.msk [vmem:[%s841_s3] sm:$0x3] %vm340_vm1, %v337_v17 }

</bundles_post_ra>
